<compile_context>
chip_gen: v6e
topology: v6e:2x2x1
jax: 0.10.0
libtpu: 0.0.40
codegen_flags: <defaults>
</compile_context>

<pallas_src>
import jax
import jax.numpy as jnp
from jax.experimental import pallas as pl
from jax.experimental.pallas import tpu as pltpu


def _round_up(x, m):
    return (x + m - 1) // m * m


def _vmem_capacity_bytes():
    try:
        return int(pltpu.get_tpu_info().vmem_capacity_bytes)
    except Exception:
        return 64 * 1024 * 1024          # conservative: v7x per-TensorCore VMEM


def moe_expert_kernel(x_ref, gu_w_ref, down_w_ref, o_ref, acc_ref):
    """One (token-tile, ff-tile) step: acc += silu(x@Wg_k)*(x@Wu_k) @ Wd_k."""
    k = pl.program_id(1)

    x = x_ref[...]
    # Fused gate+up: one wide-N MXU pass. Columns of this ff tile are laid out
    # as [gate_tile | up_tile] (arranged once at weight-prepare time).
    gu = jnp.dot(x, gu_w_ref[...], preferred_element_type=jnp.float32)
    tf = gu.shape[-1] // 2
    gate = gu[:, :tf]
    up = gu[:, tf:]
    hidden = (gate * jax.nn.sigmoid(gate)) * up            # SiLU(gate) * up, f32
    # TODO(synk): the SwiGLU intermediate is downcast to the weight dtype (bf16)
    # before the down projection; matches common practice, slight precision
    # loss vs keeping the second matmul LHS in f32.
    partial = jnp.dot(hidden.astype(down_w_ref.dtype), down_w_ref[...],
                      preferred_element_type=jnp.float32)

    @pl.when(k == 0)
    def _():
        acc_ref[...] = partial           # direct write: no zero-init + RMW

    @pl.when(k > 0)
    def _():
        acc_ref[...] += partial

    @pl.when(k == pl.num_programs(1) - 1)
    def _():
        o_ref[...] = acc_ref[...].astype(o_ref.dtype)


def prepare_expert_weights(gate_w, up_w, down_w, *, tf=None,
                           compute_dtype=jnp.bfloat16):
    """One-time weight re-layout. Call at weight-load time, NOT per forward.

    gate_w / up_w: [model_dim, ff_dim]; down_w: [ff_dim, model_dim]
    (i.e. transposes of nn.Linear.weight).
    """
    model_dim, ff_dim = gate_w.shape
    assert up_w.shape == (model_dim, ff_dim)
    assert down_w.shape == (ff_dim, model_dim)

    cdt = jnp.dtype(compute_dtype)
    itm = cdt.itemsize
    md_p = _round_up(model_dim, 128)      # lane-dense contraction/output dim

    if tf is None:
        # Keep the double-buffered weight tiles (fused gate|up + down) under
        # ~40 MiB so the full pipeline fits v7x's 64 MiB VMEM with headroom.
        tf = 512
        while tf > 128 and 2 * (md_p * 2 * tf + tf * md_p) * itm > 40 * 1024 * 1024:
            tf //= 2
    tf = max(128, min(_round_up(tf, 128), _round_up(ff_dim, 128)))
    ff_p = _round_up(ff_dim, tf)
    kt = ff_p // tf

    # Zero padding is exact: padded x cols * padded W rows contribute 0 and
    # silu(0)*0 = 0 through the padded ff columns.
    gate_p = jnp.pad(gate_w.astype(cdt),
                     ((0, md_p - model_dim), (0, ff_p - ff_dim)))
    up_p = jnp.pad(up_w.astype(cdt),
                   ((0, md_p - model_dim), (0, ff_p - ff_dim)))
    down_p = jnp.pad(down_w.astype(cdt),
                     ((0, ff_p - ff_dim), (0, md_p - model_dim)))

    # Fused [gate_tile | up_tile] per ff tile, laid out (kt, md_p, 2*tf) so
    # each per-step weight DMA is a contiguous HBM stream.
    gu_w = jnp.concatenate(
        [gate_p.reshape(md_p, kt, tf), up_p.reshape(md_p, kt, tf)],
        axis=-1).transpose(1, 0, 2)                      # (kt, md_p, 2*tf)
    down_3d = down_p.reshape(kt, tf, md_p)               # (kt, tf, md_p)

    return dict(gu_w=gu_w, down_w=down_3d, model_dim=model_dim,
                ff_dim=ff_dim, md_p=md_p, tf=tf, kt=kt, compute_dtype=cdt)


def moe_expert_forward(x, weights, *, tm=None):
    """x: [tokens, model_dim] -> [tokens, model_dim]."""
    tokens, model_dim = x.shape
    assert model_dim == weights["model_dim"]
    md_p, tf, kt = weights["md_p"], weights["tf"], weights["kt"]
    cdt = weights["compute_dtype"]
    gu_w, down_w = weights["gu_w"], weights["down_w"]

    sub = 8 if cdt.itemsize >= 4 else 16           # sublane rows per vreg
    vmem_cap = _vmem_capacity_bytes()

    if tm is None:
        # Bigger token tiles on the 128-MiB VMEM parts (v5e/v6e) push the
        # kernel past the HBM roofline knee; 256 suffices on v7x (3.2 TB/s).
        tm = 512 if vmem_cap >= 96 * 1024 * 1024 else 256

    tokens_r = _round_up(tokens, sub)
    tm = _round_up(max(sub, min(tm, tokens_r)), sub)
    # Guarantee >= 2 tiles along the parallel token axis when possible so
    # both v7x TensorCores get work.
    if tokens_r // tm < 2 and tokens_r >= 2 * sub:
        tm = _round_up(-(-tokens_r // 2), sub)
    tokens_p = _round_up(tokens, tm)
    grid = (tokens_p // tm, kt)

    x_p = jnp.pad(x.astype(cdt),
                  ((0, tokens_p - tokens), (0, md_p - model_dim)))

    out_dtype = x.dtype
    itm = cdt.itemsize
    out_it = jnp.dtype(out_dtype).itemsize
    # Double-buffered input/output tiles + f32 accumulator scratch.
    footprint = (2 * tm * md_p * itm              # x
                 + 2 * md_p * 2 * tf * itm        # fused gate|up weights
                 + 2 * tf * md_p * itm            # down weights
                 + 2 * tm * md_p * out_it         # output
                 + tm * md_p * 4)                 # accumulator
    vmem_limit = int(min(vmem_cap - 8 * 1024 * 1024,
                         max(footprint * 13 // 10 + (4 << 20), 32 << 20)))

    cost = pl.CostEstimate(
        flops=6 * tokens_p * md_p * (kt * tf),
        transcendentals=tokens_p * (kt * tf),
        bytes_accessed=(gu_w.size + down_w.size) * itm
        + x_p.size * itm + tokens_p * md_p * out_it)

    out_p = pl.pallas_call(
        moe_expert_kernel,
        out_shape=jax.ShapeDtypeStruct((tokens_p, md_p), out_dtype),
        grid_spec=pltpu.PrefetchScalarGridSpec(
            num_scalar_prefetch=0,
            grid=grid,
            in_specs=[
                # token tile of activations (revisited across ff axis)
                pl.BlockSpec((tm, md_p), lambda i, k: (i, 0)),
                # fused gate|up weight tile, contiguous per ff step
                pl.BlockSpec((pl.Squeezed(), md_p, 2 * tf),
                             lambda i, k: (k, 0, 0)),
                # down-projection weight tile, contiguous per ff step
                pl.BlockSpec((pl.Squeezed(), tf, md_p),
                             lambda i, k: (k, 0, 0)),
            ],
            out_specs=pl.BlockSpec((tm, md_p), lambda i, k: (i, 0)),
            scratch_shapes=[pltpu.VMEM((tm, md_p), jnp.float32)],
        ),
        compiler_params=pltpu.CompilerParams(
            dimension_semantics=("parallel", "arbitrary"),
            vmem_limit_bytes=vmem_limit,
        ),
        cost_estimate=cost,
    )(x_p, gu_w, down_w)

    return out_p[:tokens, :model_dim]


def moe_expert_ref(x, gate_w, up_w, down_w):
    """Pure-JAX f32 reference matching the PyTorch module semantics."""
    gate = jax.nn.silu(x @ gate_w)
    up = x @ up_w
    return (gate * up) @ down_w


if __name__ == "__main__":
    # Small shapes implied by the module: batch=2, seq=8, model_dim=32, ff_dim=64
    batch, seq, model_dim, ff_dim = 2, 8, 32, 64

    key = jax.random.PRNGKey(0)
    kx, kg, ku, kd = jax.random.split(key, 4)

    x = jax.random.normal(kx, (batch, seq, model_dim), dtype=jnp.float32)
    # Weights stored as (in_dim, out_dim), i.e. transpose of nn.Linear.weight.
    gate_w = jax.random.uniform(kg, (model_dim, ff_dim), jnp.float32,
                                -1.0, 1.0) / jnp.sqrt(model_dim)
    up_w = jax.random.uniform(ku, (model_dim, ff_dim), jnp.float32,
                              -1.0, 1.0) / jnp.sqrt(model_dim)
    down_w = jax.random.uniform(kd, (ff_dim, model_dim), jnp.float32,
                                -1.0, 1.0) / jnp.sqrt(ff_dim)

    # One-time weight re-layout (hoisted out of the forward path).
    weights = prepare_expert_weights(gate_w, up_w, down_w)

    # Linear acts on the last dim only, so flattening matches PyTorch exactly.
    x_flat = x.reshape(batch * seq, model_dim)

    out_flat = moe_expert_forward(x_flat, weights)
    out = out_flat.reshape(batch, seq, model_dim)
    jax.block_until_ready(out)

    ref = moe_expert_ref(x_flat, gate_w, up_w, down_w).reshape(
        batch, seq, model_dim)
    # bf16 MXU operands with f32 accumulation -> relaxed tolerance vs f32 ref.
    assert jnp.allclose(out, ref, atol=2e-2, rtol=2e-2), "mismatch vs reference"

    print("KERNEL_OK")
</pallas_src>

<mosaic_0001>
module attributes {stable_mosaic.version = 11 : i64} {
  func.func @moe_expert_kernel(%arg0: i32, %arg1: i32, %arg2: memref<16x128xbf16, #tpu.memory_space<vmem>>, %arg3: memref<1x128x256xbf16, #tpu.memory_space<vmem>>, %arg4: memref<1x128x128xbf16, #tpu.memory_space<vmem>>, %arg5: memref<16x128xf32, #tpu.memory_space<vmem>>, %arg6: memref<16x128xf32, #tpu.memory_space<vmem>>) attributes {dimension_semantics = [#tpu.dimension_semantics<parallel>, #tpu.dimension_semantics<arbitrary>], iteration_bounds = array<i64: 1, 1>, scalar_prefetch = 0 : i64, scratch_operands = 1 : i64, tpu.core_type = #tpu.core_type<tc>, window_params = [{transform_indices = @transform_0, window_bounds = array<i64: 16, 128>}, {transform_indices = @transform_1, window_bounds = array<i64: 1, 128, 256>}, {transform_indices = @transform_2, window_bounds = array<i64: 1, 128, 128>}, {transform_indices = @transform_3, window_bounds = array<i64: 16, 128>}]} {
    %c0 = arith.constant 0 : index
    %c0_0 = arith.constant 0 : index
    %0 = vector.load %arg2[%c0, %c0_0] : memref<16x128xbf16, #tpu.memory_space<vmem>>, vector<16x128xbf16>
    %c0_1 = arith.constant 0 : index
    %c0_2 = arith.constant 0 : index
    %c0_3 = arith.constant 0 : index
    %1 = vector.load %arg3[%c0_1, %c0_2, %c0_3] : memref<1x128x256xbf16, #tpu.memory_space<vmem>>, vector<1x128x256xbf16>
    %2 = vector.shape_cast %1 : vector<1x128x256xbf16> to vector<128x256xbf16>
    %cst = arith.constant dense<0.000000e+00> : vector<16x256xf32>
    %3 = tpu.matmul %0, %2, %cst {dimension_numbers = #tpu.dot_dimension_numbers<[1], [0], [0], [1], [0, 0, 1, 1], [], []>} : vector<16x128xbf16>, vector<128x256xbf16>, vector<16x256xf32> -> vector<16x256xf32>
    %4 = vector.extract_strided_slice %3 {offsets = [0, 0], sizes = [16, 128], strides = [1, 1]} : vector<16x256xf32> to vector<16x128xf32>
    %5 = vector.extract_strided_slice %3 {offsets = [0, 128], sizes = [16, 128], strides = [1, 1]} : vector<16x256xf32> to vector<16x128xf32>
    %6 = arith.negf %4 : vector<16x128xf32>
    %7 = math.exp %6 : vector<16x128xf32>
    %cst_4 = arith.constant 1.000000e+00 : f32
    %8 = vector.broadcast %cst_4 : f32 to vector<16x128xf32>
    %9 = arith.addf %8, %7 : vector<16x128xf32>
    %10 = arith.divf %8, %9 : vector<16x128xf32>
    %11 = arith.mulf %4, %10 : vector<16x128xf32>
    %12 = arith.mulf %11, %5 : vector<16x128xf32>
    %13 = arith.truncf %12 : vector<16x128xf32> to vector<16x128xbf16>
    %c0_5 = arith.constant 0 : index
    %c0_6 = arith.constant 0 : index
    %c0_7 = arith.constant 0 : index
    %14 = vector.load %arg4[%c0_5, %c0_6, %c0_7] : memref<1x128x128xbf16, #tpu.memory_space<vmem>>, vector<1x128x128xbf16>
    %15 = vector.shape_cast %14 : vector<1x128x128xbf16> to vector<128x128xbf16>
    %cst_8 = arith.constant dense<0.000000e+00> : vector<16x128xf32>
    %16 = tpu.matmul %13, %15, %cst_8 {dimension_numbers = #tpu.dot_dimension_numbers<[1], [0], [0], [1], [0, 0, 1, 1], [], []>} : vector<16x128xbf16>, vector<128x128xbf16>, vector<16x128xf32> -> vector<16x128xf32>
    %c0_i32 = arith.constant 0 : i32
    %17 = arith.cmpi eq, %arg1, %c0_i32 : i32
    %18 = arith.extui %17 : i1 to i32
    %c0_i32_9 = arith.constant 0 : i32
    %19 = arith.cmpi ne, %18, %c0_i32_9 : i32
    scf.if %19 {
      %c0_14 = arith.constant 0 : index
      %c0_15 = arith.constant 0 : index
      %26 = vector.load %arg6[%c0_14, %c0_15] : memref<16x128xf32, #tpu.memory_space<vmem>>, vector<16x128xf32>
      tpu.vector_store %arg6[%c0_14, %c0_15], %16 {strides = array<i32>} : memref<16x128xf32, #tpu.memory_space<vmem>>, vector<16x128xf32>,
    } else {
    }
    %c0_i32_10 = arith.constant 0 : i32
    %20 = arith.cmpi sgt, %arg1, %c0_i32_10 : i32
    %21 = arith.extui %20 : i1 to i32
    %c0_i32_11 = arith.constant 0 : i32
    %22 = arith.cmpi ne, %21, %c0_i32_11 : i32
    scf.if %22 {
      %c0_14 = arith.constant 0 : index
      %c0_15 = arith.constant 0 : index
      %26 = vector.load %arg6[%c0_14, %c0_15] : memref<16x128xf32, #tpu.memory_space<vmem>>, vector<16x128xf32>
      %27 = arith.addf %26, %16 : vector<16x128xf32>
      %c0_16 = arith.constant 0 : index
      %c0_17 = arith.constant 0 : index
      %28 = vector.load %arg6[%c0_16, %c0_17] : memref<16x128xf32, #tpu.memory_space<vmem>>, vector<16x128xf32>
      tpu.vector_store %arg6[%c0_16, %c0_17], %27 {strides = array<i32>} : memref<16x128xf32, #tpu.memory_space<vmem>>, vector<16x128xf32>,
    } else {
    }
    %c0_i32_12 = arith.constant 0 : i32
    %23 = arith.cmpi eq, %arg1, %c0_i32_12 : i32
    %24 = arith.extui %23 : i1 to i32
    %c0_i32_13 = arith.constant 0 : i32
    %25 = arith.cmpi ne, %24, %c0_i32_13 : i32
    scf.if %25 {
      %c0_14 = arith.constant 0 : index
      %c0_15 = arith.constant 0 : index
      %26 = vector.load %arg6[%c0_14, %c0_15] : memref<16x128xf32, #tpu.memory_space<vmem>>, vector<16x128xf32>
      %c0_16 = arith.constant 0 : index
      %c0_17 = arith.constant 0 : index
      %27 = vector.load %arg5[%c0_16, %c0_17] : memref<16x128xf32, #tpu.memory_space<vmem>>, vector<16x128xf32>
      tpu.vector_store %arg5[%c0_16, %c0_17], %26 {strides = array<i32>} : memref<16x128xf32, #tpu.memory_space<vmem>>, vector<16x128xf32>,
    } else {
    }
    return
  }
  func.func @transform_0(%arg0: i32, %arg1: i32) -> (i32, i32) {
    %c0_i32 = arith.constant 0 : i32
    %c0_i32_0 = arith.constant 0 : i32
    return %arg0, %c0_i32 : i32, i32
  }
  func.func @transform_1(%arg0: i32, %arg1: i32) -> (i32, i32, i32) {
    %c0_i32 = arith.constant 0 : i32
    %c0_i32_0 = arith.constant 0 : i32
    %c0_i32_1 = arith.constant 0 : i32
    return %arg1, %c0_i32, %c0_i32_0 : i32, i32, i32
  }
  func.func @transform_2(%arg0: i32, %arg1: i32) -> (i32, i32, i32) {
    %c0_i32 = arith.constant 0 : i32
    %c0_i32_0 = arith.constant 0 : i32
    %c0_i32_1 = arith.constant 0 : i32
    return %arg1, %c0_i32, %c0_i32_0 : i32, i32, i32
  }
  func.func @transform_3(%arg0: i32, %arg1: i32) -> (i32, i32) {
    %c0_i32 = arith.constant 0 : i32
    %c0_i32_0 = arith.constant 0 : i32
    return %arg0, %c0_i32 : i32, i32
  }
}

</mosaic_0001>

<bundles_post_ra>
// kernel: tpu_custom_call.1
= control target key start
LH: loop header
LB: loop body
LE: loop exit
PB: predicated region body
PF: predicated region fallthrough
CT: control target
= control target key end

     0   :  { %8 = vsyncpa [#allocation4], 0  ;;  %s610_s0 = inlined_call_operand.hbm [shape: bf16[16,128], index: 0, kind: input, shape index: {}]   ;;  %s611_s1 = inlined_call_operand.hbm [shape: bf16[1,128,256], index: 1, kind: input, shape index: {}]   ;;  %s612_s2 = inlined_call_operand.hbm [shape: bf16[1,128,128], index: 2, kind: input, shape index: {}]   ;;  %s613_s3 = inlined_call_operand.hbm [shape: f32[16,128], index: 3, kind: output, shape index: {}]  }
   0x1   :  { %9 = vsyncpa [#allocation7], 0 }
   0x2   :  { %10 = vsyncpa [#allocation5], 0  ;;  %s561_s12 = smov [#allocation6]  }
   0x3   :  { %s28_s13 = sshll.u32 %s561_s12, 4  ;;  %s29_s13 = int_to_ptr.vmem [resolvable:$true] %s28_s13 }
   0x4   :  { %s483_s14 = scalar_lea.vmem %s29_s13, 2048  ;;  %p488_p1 = scmp.lt.s32.totalorder %s29_s13, %s29_s13 }
   0x5   :  { %p484_p0 = scmp.ne.s32.totalorder %s29_s13, %s483_s14  ;;  %p489_p2 = scmp.lt.s32.totalorder %s483_s14, %s483_s14 }
   0x7   :  { %p490_p3 = por %p489_p2, %p488_p1 }
   0x9   :  { %p491_p4 = pnand %p490_p3, %p484_p0 }
   0xb   :  { %494 = shalt.err (!%p491_p4)
}
   0xc   :  { %s562_s15 = smov 128   ;;  %s563_s16 = smov 8  }
   0xd   :  { %34 = dma.hbm_to_vmem [thread:$0]  %s611_s1, 2048, %s29_s13, [#allocation7], %s562_s15, %s562_s15, %s563_s16  }
   0xe   :  { %s564_s19 = smov [#allocation3]  }
   0xf   :  { %s16_s20 = sshll.u32 %s564_s19, 4  ;;  %s17_s20 = int_to_ptr.vmem [resolvable:$true] %s16_s20 }
  0x10   :  { %s503_s21 = scalar_lea.vmem %s17_s20, 128  ;;  %p508_p6 = scmp.lt.s32.totalorder %s17_s20, %s17_s20 }
  0x11   :  { %p504_p5 = scmp.ne.s32.totalorder %s17_s20, %s503_s21  ;;  %p509_p7 = scmp.lt.s32.totalorder %s503_s21, %s503_s21 }
  0x13   :  { %p510_p8 = por %p509_p7, %p508_p6 }
  0x15   :  { %p511_p9 = pnand %p510_p8, %p504_p5 }
  0x17   :  { %514 = shalt.err (!%p511_p9)
}
  0x18   :  { %s565_s22 = smov 64   ;;  %s566_s23 = smov 4  }
  0x19   :  { %22 = dma.hbm_to_vmem [thread:$0]  %s610_s0, 128, %s17_s20, [#allocation4], %s565_s22, %s565_s22, %s566_s23  }
  0x1a   :  { %s567_s26 = smov [#allocation8]  }
  0x1b   :  { %s40_s27 = sshll.u32 %s567_s26, 4  ;;  %s41_s27 = int_to_ptr.vmem [resolvable:$true] %s40_s27 }
  0x1c   :  { %s523_s1 = scalar_lea.vmem %s41_s27, 1024  ;;  %p528_p11 = scmp.lt.s32.totalorder %s41_s27, %s41_s27 }
  0x1d   :  { %p524_p10 = scmp.ne.s32.totalorder %s41_s27, %s523_s1  ;;  %p529_p12 = scmp.lt.s32.totalorder %s523_s1, %s523_s1 }
  0x1f   :  { %p530_p13 = por %p529_p12, %p528_p11 }
  0x21   :  { %p531_p0 = pnand %p530_p13, %p524_p10 }
  0x23   :  { %534 = shalt.err (!%p531_p0)
}
  0x24   :  { %46 = dma.hbm_to_vmem [thread:$0]  %s612_s2, 1024, %s41_s27, [#allocation7], %s565_s22, %s565_s22, %s566_s23  }
  0x25   :  { %555 = dma.done.wait [#allocation4], 128  }
  0x26   :  { %556 = vsyncadd [#allocation4], 4294967168 }
  0x27   :  { %557 = dma.done.wait [#allocation7], 3072  }
  0x28   :  { %558 = vsyncadd [#allocation7], 4294964224  ;;  %v568_v0 = vmov 0   ;;  %v434_v1 = vld [vmem:[#allocation6 + $0x74] ss:$8 sps:$4 sm:$0xff]   ;;  %v569_v19 = vmov 0.0  }
  0x29   :  { %193 = vmatprep.mubr.bf16.mxu0 %v568_v0  ;;  %v436_v2 = vld [vmem:[#allocation6 + $0x70] ss:$8 sps:$4 sm:$0xff]   ;;  %161 = vmatprep.subr.bf16.mxu0 %v434_v1  ;;  %v437_v3 = vld [vmem:[#allocation6 + $0x64] ss:$8 sps:$4 sm:$0xff]   ;;  %v439_v4 = vld [vmem:[#allocation6 + $0x60] ss:$8 sps:$4 sm:$0xff]  }
  0x2a   :  { %162 = vmatpush1.bf16.msra.mxu0 %v436_v2  ;;  %v440_v5 = vld [vmem:[#allocation6 + $0x54] ss:$8 sps:$4 sm:$0xff]   ;;  %v442_v6 = vld [vmem:[#allocation6 + $0x50] ss:$8 sps:$4 sm:$0xff]   ;;  %v443_v7 = vld [vmem:[#allocation6 + $0x44] ss:$8 sps:$4 sm:$0xff]   ;;  %403 = vmatprep.subr.bf16.mxu1 %v569_v19 }
  0x2b   :  { %163 = vmatprep.subr.bf16.mxu0 %v437_v3  ;;  %v445_v8 = vld [vmem:[#allocation6 + $0x40] ss:$8 sps:$4 sm:$0xff]   ;;  %v446_v9 = vld [vmem:[#allocation6 + $0x34] ss:$8 sps:$4 sm:$0xff]   ;;  %v448_v10 = vld [vmem:[#allocation6 + $0x30] ss:$8 sps:$4 sm:$0xff]  }
  0x2c   :  { %v449_v11 = vld [vmem:[#allocation6 + $0x24] ss:$8 sps:$4 sm:$0xff]   ;;  %v451_v12 = vld [vmem:[#allocation6 + $0x20] ss:$8 sps:$4 sm:$0xff]   ;;  %v452_v13 = vld [vmem:[#allocation6 + $0x14] ss:$8 sps:$4 sm:$0xff]  }
  0x2d   :  { %v454_v14 = vld [vmem:[#allocation6 + $0x10] ss:$8 sps:$4 sm:$0xff]   ;;  %v455_v15 = vld [vmem:[#allocation6 + $0x4] ss:$8 sps:$4 sm:$0xff]   ;;  %v457_v16 = vld [vmem:[#allocation6] ss:$8 sps:$4 sm:$0xff]  }
  0x2e   :  { %164 = vmatpush1.bf16.msra.mxu0 %v439_v4  ;;  %v458_v17 = vld [vmem:[#allocation3] sm:$0xff]   ;;  %v460_v20 = vld [vmem:[#allocation8 + $0x30] sm:$0xff]   ;;  %v461_v21 = vld [vmem:[#allocation8 + $0x28] sm:$0xff]   ;;  %vm570_vm0 = vmmov 0   ;;  %s571_s0 = smov [#allocation9]  }
  0x2f   :  { %165 = vmatprep.subr.bf16.mxu0 %v440_v5  ;;  %v459_v18 = vld [vmem:[#allocation8 + $0x38] sm:$0xff]   ;;  %v462_v22 = vld [vmem:[#allocation8 + $0x20] sm:$0xff]   ;;  %v464_v24 = vld [vmem:[#allocation8 + $0x10] sm:$0xff]   ;;  %419 = vmatprep.mubr.msk.bf16.mxu1 %vm570_vm0, %v569_v19  ;;  %s354_s2 = sshll.u32 %s571_s0, 4  ;;  %s355_s2 = int_to_ptr.vmem [resolvable:$true] %s354_s2 }
  0x30   :  { %404 = vmatpush3.bf16.msra.mxu1 %v459_v18  ;;  %v463_v23 = vld [vmem:[#allocation8 + $0x18] sm:$0xff]   ;;  %v465_v25 = vld [vmem:[#allocation8 + $0x8] sm:$0xff]   ;;  %v466_v26 = vld [vmem:[#allocation8] sm:$0xff]   ;;  %s535_s30 = scalar_lea.vmem %s355_s2, 256  ;;  %p540_p2 = scmp.lt.s32.totalorder %s355_s2, %s355_s2 }
  0x31   :  { %405 = vmatprep.subr.bf16.mxu1 %v569_v19  ;;  %p536_p1 = scmp.ne.s32.totalorder %s355_s2, %s535_s30  ;;  %p541_p3 = scmp.lt.s32.totalorder %s535_s30, %s535_s30 }
  0x32   :  { %166 = vmatpush1.bf16.msra.mxu0 %v442_v6 }
  0x33   :  { %167 = vmatprep.subr.bf16.mxu0 %v443_v7  ;;  %p542_p4 = por %p541_p3, %p540_p2 }
  0x34   :  { %406 = vmatpush3.bf16.msra.mxu1 %v460_v20 }
  0x35   :  { %407 = vmatprep.subr.bf16.mxu1 %v569_v19  ;;  %p543_p5 = pnand %p542_p4, %p536_p1 }
  0x36   :  { %168 = vmatpush1.bf16.msra.mxu0 %v445_v8 }
  0x37   :  { %169 = vmatprep.subr.bf16.mxu0 %v446_v9 }
  0x38   :  { %408 = vmatpush3.bf16.msra.mxu1 %v461_v21 }
  0x39   :  { %409 = vmatprep.subr.bf16.mxu1 %v569_v19 }
  0x3a   :  { %170 = vmatpush1.bf16.msra.mxu0 %v448_v10 }
  0x3b   :  { %171 = vmatprep.subr.bf16.mxu0 %v449_v11 }
  0x3c   :  { %410 = vmatpush3.bf16.msra.mxu1 %v462_v22 }
  0x3d   :  { %411 = vmatprep.subr.bf16.mxu1 %v569_v19 }
  0x3e   :  { %172 = vmatpush1.bf16.msra.mxu0 %v451_v12 }
  0x3f   :  { %173 = vmatprep.subr.bf16.mxu0 %v452_v13 }
  0x40   :  { %412 = vmatpush3.bf16.msra.mxu1 %v463_v23 }
  0x41   :  { %413 = vmatprep.subr.bf16.mxu1 %v569_v19 }
  0x42   :  { %174 = vmatpush1.bf16.msra.mxu0 %v454_v14 }
  0x43   :  { %175 = vmatprep.subr.bf16.mxu0 %v455_v15 }
  0x44   :  { %414 = vmatpush3.bf16.msra.mxu1 %v464_v24 }
  0x45   :  { %415 = vmatprep.subr.bf16.mxu1 %v569_v19 }
  0x46   :  { %176 = vmatpush1.bf16.msra.mxu0 %v457_v16 }
  0x48   :  { %416 = vmatpush3.bf16.msra.mxu1 %v465_v25 }
  0x49   :  { %194 = vmatmul.mubr.bf16.vlgmr.msra.gmra.mxu0 %v458_v17  ;;  %417 = vmatprep.subr.bf16.mxu1 %v569_v19 }
  0x4c   :  { %418 = vmatpush3.bf16.msra.mxu1 %v466_v26 }
 0x109   :  { %v195_v27 = vpop.f32.mrf.mxu0 }
 0x10a   :  { %v384_v28 = vmul.f32 -1.442695, %v195_v27 }
 0x10b   :  { %v197_v29 = vpop.f32.mrf.mxu0 }
 0x10c   :  { %467 = vpow2.f32 %v384_v28 }
 0x10d   :  { %v199_v30 = vpop.f32.mrf.mxu0 }
 0x10e   :  { %v385_v31 = vmul.f32 -1.442695, %v199_v30 }
 0x10f   :  { %v201_v40 = vpop.f32.mrf.mxu0 }
 0x110   :  { %469 = vpow2.f32 %v385_v31 }
 0x119   :  { %v468_v32 = vpop.eup %467 }
 0x11a   :  { %v210_v33 = vadd.f32 1.0, %v468_v32 }
 0x11c   :  { %471 = vrcp.f32 %v210_v33 }
 0x11d   :  { %v470_v34 = vpop.eup %469 }
 0x11e   :  { %v211_v35 = vadd.f32 1.0, %v470_v34 }
 0x120   :  { %473 = vrcp.f32 %v211_v35 }
 0x129   :  { %v472_v36 = vpop.eup %471 }
 0x12a   :  { %v216_v37 = vmul.f32 %v472_v36, %v195_v27 }
 0x12c   :  { %v218_v41 = vmul.f32 %v216_v37, %v197_v29 }
 0x12d   :  { %v474_v38 = vpop.eup %473 }
 0x12e   :  { %v217_v39 = vmul.f32 %v474_v38, %v199_v30 }
 0x130   :  { %v219_v42 = vmul.f32 %v217_v39, %v201_v40 }
 0x132   :  { %v220_v43 = vpack.c.bf16 %v219_v42, %v218_v41 }
 0x134   :  { %420 = vmatmul.mubr.bf16.vlgmr.msra.gmra.mxu1 %v220_v43 }
 0x1f4   :  { %v319_v44 = vpop.f32.mrf.mxu1 }
 0x1f5   :  { %347 = vst [vmem:[#allocation9] sm:$0xff] %v319_v44 }
 0x1f6   :  { %v421_v45 = vpop.f32.mrf.mxu1 }
 0x1f8   :  { %v322_v46 = vpop.f32.mrf.mxu1 }
 0x1f9   :  { %348 = vst [vmem:[#allocation9 + $0x8] sm:$0xff] %v322_v46 }
 0x1fa   :  { %v422_v47 = vpop.f32.mrf.mxu1 }
 0x1fb   :  { %546 = shalt.err (!%p543_p5)
}
 0x1fc   :  { %360 = dma.vmem_to_hbm [thread:$0]  %s355_s2, 256, %s613_s3, [#allocation5], %s562_s15, %s562_s15, %s563_s16  }
 0x1fd   :  { %559 = dma.done.wait [#allocation5], 256  }
 0x1fe   :  { %560 = vsyncadd [#allocation5], 4294967040 }
 0x1ff   :  { %364 = vsyncpa [#allocation4], 1 }
 0x200   :  { %365 = vsyncpa [#allocation7], 1 }
 0x201   :  { %366 = vsyncpa [#allocation5], 1 }

</bundles_post_ra>
